<compile_context>
chip_gen: v5e
topology: v5e:2x2
jax: 0.10.0
libtpu: 0.0.40
codegen_flags: <defaults>
</compile_context>

<pallas_src>
import functools

import jax
import jax.numpy as jnp
from jax.experimental import pallas as pl
from jax.experimental.pallas import tpu as pltpu


_LANE = 128
_SUBLANE = 8
# Below this many elements a pallas_call is pure dispatch overhead; use XLA.
_PALLAS_MIN_ELEMS = 32 * 1024
# Per-buffer VMEM budget for the streamed input tile.  BlockSpec double
# buffers it (~2x), which keeps total VMEM use ~16-17 MiB: safe under the
# 32 MiB scoped default on v5e/v6e/v7x and v7x's 64 MiB physical VMEM.
_INPUT_TILE_BYTES = 8 * 1024 * 1024
_MAX_TC = 512  # channel-tile cap (sublane axis of the streamed block)


def _round_up(x, m):
    return ((x + m - 1) // m) * m


def _cdiv(a, b):
    return -(-a // b)


def _max_pool_kernel(x_ref, o_ref, acc_ref, *, neutral):
    # x_ref: (1, TC, TN)   acc_ref: (TC, 1)   o_ref: (1, TC, 1)
    @pl.when(pl.program_id(2) == 0)
    def _init():
        acc_ref[...] = jnp.full(acc_ref.shape, neutral, dtype=acc_ref.dtype)

    tile = x_ref[0]  # (TC, TN)
    acc_ref[...] = jnp.maximum(acc_ref[...],
                               jnp.max(tile, axis=1, keepdims=True))

    @pl.when(pl.program_id(2) == pl.num_programs(2) - 1)
    def _store():
        o_ref[0] = acc_ref[...].astype(o_ref.dtype)


def _avg_pool_kernel(x_ref, o_ref, acc_ref, *, inv_n):
    # f32 accumulation; divide by the TRUE logical N (not the block N).
    @pl.when(pl.program_id(2) == 0)
    def _init():
        acc_ref[...] = jnp.zeros(acc_ref.shape, dtype=acc_ref.dtype)

    tile = x_ref[0].astype(jnp.float32)  # (TC, TN)
    acc_ref[...] = acc_ref[...] + jnp.sum(tile, axis=1, keepdims=True)

    @pl.when(pl.program_id(2) == pl.num_programs(2) - 1)
    def _store():
        o_ref[0] = (acc_ref[...] * inv_n).astype(o_ref.dtype)


def pooling(x, pool_type: str = "max", *, force_pallas: bool = False):
    """Pallas equivalent of Pooling.forward.  x: (B, C, N) -> (B, C)."""
    if pool_type not in ("max", "avg"):
        raise ValueError(f"unknown pool_type: {pool_type}")
    B, C, N = x.shape

    # Tiny inputs: XLA's fused reduce is strictly faster than a pallas_call.
    if (B * C * N < _PALLAS_MIN_ELEMS) and not force_pallas:
        return jnp.max(x, axis=2) if pool_type == "max" else jnp.mean(x, axis=2)

    dtype = x.dtype
    itemsize = dtype.itemsize

    # ---- tile geometry ---------------------------------------------------
    # C sits on the sublane axis of the streamed block.
    c8 = _round_up(C, _SUBLANE)
    num_c_tiles = _cdiv(c8, _MAX_TC)
    tc = _round_up(_cdiv(c8, num_c_tiles), _SUBLANE)
    c_pad = num_c_tiles * tc

    # N is the streamed lane axis; biggest lane-aligned tile within budget.
    n128 = _round_up(N, _LANE)
    max_tn = max(_LANE, (_INPUT_TILE_BYTES // (tc * itemsize)) // _LANE * _LANE)
    max_tn = min(max_tn, 32768)
    num_n_tiles = _cdiv(n128, max_tn)
    tn = _round_up(_cdiv(n128, num_n_tiles), _LANE)
    n_pad = num_n_tiles * tn

    # ---- padding with reduction-neutral values ----------------------------
    if pool_type == "max":
        if jnp.issubdtype(dtype, jnp.floating):
            neutral = float("-inf")
        else:
            neutral = int(jnp.iinfo(dtype).min)
        pad_value = neutral
    else:
        pad_value = 0

    if c_pad != C or n_pad != N:
        x = jnp.pad(x, ((0, 0), (0, c_pad - C), (0, n_pad - N)),
                    constant_values=pad_value)

    # ---- kernel selection --------------------------------------------------
    if pool_type == "max":
        kernel = functools.partial(_max_pool_kernel, neutral=neutral)
        acc_dtype = dtype          # max is exact in the input dtype
    else:
        kernel = functools.partial(_avg_pool_kernel, inv_n=1.0 / N)
        acc_dtype = jnp.float32    # accumulate sums in f32

    grid = (B, c_pad // tc, n_pad // tn)

    out_padded = pl.pallas_call(
        kernel,
        out_shape=jax.ShapeDtypeStruct((B, c_pad, 1), dtype),
        grid_spec=pltpu.PrefetchScalarGridSpec(
            num_scalar_prefetch=0,
            grid=grid,
            in_specs=[pl.BlockSpec((1, tc, tn), lambda b, c, n: (b, c, n))],
            out_specs=pl.BlockSpec((1, tc, 1), lambda b, c, n: (b, c, 0)),
            scratch_shapes=[pltpu.VMEM((tc, 1), acc_dtype)],
        ),
        compiler_params=pltpu.CompilerParams(
            dimension_semantics=("parallel", "parallel", "arbitrary")),
    )(x)

    return out_padded[:, :C, 0]


if __name__ == "__main__":
    key0, key1 = jax.random.split(jax.random.PRNGKey(0), 2)

    # 1) Small shape consistent with the module: batch=2, channels=4, points=16.
    #    force_pallas=True so the Pallas kernel itself runs (also exercises
    #    C (4->8) and N (16->128) padding with neutral values).
    B, C, N = 2, 4, 16
    x_small = jax.random.normal(key0, (B, C, N), dtype=jnp.float32)

    out_max = jax.block_until_ready(pooling(x_small, "max", force_pallas=True))
    assert out_max.shape == (B, C)
    assert jnp.allclose(out_max, jnp.max(x_small, axis=2), atol=1e-6), "max mismatch"

    out_avg = jax.block_until_ready(pooling(x_small, "avg", force_pallas=True))
    assert out_avg.shape == (B, C)
    assert jnp.allclose(out_avg, jnp.mean(x_small, axis=2), atol=1e-6), "avg mismatch"

    # Default dispatch (small-input XLA fallback) must also match.
    assert jnp.allclose(jax.block_until_ready(pooling(x_small, "max")),
                        jnp.max(x_small, axis=2), atol=1e-6)
    assert jnp.allclose(jax.block_until_ready(pooling(x_small, "avg")),
                        jnp.mean(x_small, axis=2), atol=1e-6)

    # 2) Moderate shape exercising the tiled path: multiple C tiles (600->2x304),
    #    multiple N tiles with accumulation, and padding in both C and N.
    B2, C2, N2 = 2, 600, 10000
    x_big = jax.random.normal(key1, (B2, C2, N2), dtype=jnp.float32)

    out_max2 = jax.block_until_ready(pooling(x_big, "max"))
    assert out_max2.shape == (B2, C2)
    assert jnp.allclose(out_max2, jnp.max(x_big, axis=2), atol=1e-6), "tiled max mismatch"

    out_avg2 = jax.block_until_ready(pooling(x_big, "avg"))
    assert out_avg2.shape == (B2, C2)
    assert jnp.allclose(out_avg2, jnp.mean(x_big, axis=2),
                        atol=1e-5, rtol=1e-5), "tiled avg mismatch"

    print("KERNEL_OK")
</pallas_src>

<mosaic_0001>
module attributes {stable_mosaic.version = 11 : i64} {
  func.func @_max_pool_kernel(%arg0: i32, %arg1: i32, %arg2: i32, %arg3: memref<1x8x128xf32, #tpu.memory_space<vmem>>, %arg4: memref<1x8x1xf32, #tpu.memory_space<vmem>>, %arg5: memref<8x1xf32, #tpu.memory_space<vmem>>) attributes {dimension_semantics = [#tpu.dimension_semantics<parallel>, #tpu.dimension_semantics<parallel>, #tpu.dimension_semantics<arbitrary>], iteration_bounds = array<i64: 2, 1, 1>, scalar_prefetch = 0 : i64, scratch_operands = 1 : i64, tpu.core_type = #tpu.core_type<tc>, window_params = [{transform_indices = @transform_0, window_bounds = array<i64: 1, 8, 128>}, {transform_indices = @transform_1, window_bounds = array<i64: 1, 8, 1>}]} {
    %c0_i32 = arith.constant 0 : i32
    %0 = arith.cmpi eq, %arg2, %c0_i32 : i32
    %1 = arith.extui %0 : i1 to i32
    %c0_i32_0 = arith.constant 0 : i32
    %2 = arith.cmpi ne, %1, %c0_i32_0 : i32
    scf.if %2 {
      %cst_9 = arith.constant 0xFF800000 : f32
      %13 = vector.broadcast %cst_9 : f32 to vector<8x1xf32>
      %c0_10 = arith.constant 0 : index
      %c0_11 = arith.constant 0 : index
      %14 = vector.load %arg5[%c0_10, %c0_11] : memref<8x1xf32, #tpu.memory_space<vmem>>, vector<8x1xf32>
      tpu.vector_store %arg5[%c0_10, %c0_11], %13 {strides = array<i32>} : memref<8x1xf32, #tpu.memory_space<vmem>>, vector<8x1xf32>,
    } else {
    }
    %c0 = arith.constant 0 : index
    %c0_1 = arith.constant 0 : index
    %c0_2 = arith.constant 0 : index
    %3 = vector.load %arg3[%c0, %c0_1, %c0_2] : memref<1x8x128xf32, #tpu.memory_space<vmem>>, vector<1x8x128xf32>
    %4 = vector.shape_cast %3 : vector<1x8x128xf32> to vector<8x128xf32>
    %c0_3 = arith.constant 0 : index
    %c0_4 = arith.constant 0 : index
    %5 = vector.load %arg5[%c0_3, %c0_4] : memref<8x1xf32, #tpu.memory_space<vmem>>, vector<8x1xf32>
    %cst = arith.constant dense<0xFF800000> : vector<8xf32>
    %6 = vector.multi_reduction <maximumf>, %4, %cst [1] : vector<8x128xf32> to vector<8xf32>
    %7 = vector.shape_cast %6 : vector<8xf32> to vector<8x1xf32>
    %8 = arith.maximumf %5, %7 : vector<8x1xf32>
    %c0_5 = arith.constant 0 : index
    %c0_6 = arith.constant 0 : index
    %9 = vector.load %arg5[%c0_5, %c0_6] : memref<8x1xf32, #tpu.memory_space<vmem>>, vector<8x1xf32>
    tpu.vector_store %arg5[%c0_5, %c0_6], %8 {strides = array<i32>} : memref<8x1xf32, #tpu.memory_space<vmem>>, vector<8x1xf32>,
    %c0_i32_7 = arith.constant 0 : i32
    %10 = arith.cmpi eq, %arg2, %c0_i32_7 : i32
    %11 = arith.extui %10 : i1 to i32
    %c0_i32_8 = arith.constant 0 : i32
    %12 = arith.cmpi ne, %11, %c0_i32_8 : i32
    scf.if %12 {
      %c0_9 = arith.constant 0 : index
      %c0_10 = arith.constant 0 : index
      %13 = vector.load %arg5[%c0_9, %c0_10] : memref<8x1xf32, #tpu.memory_space<vmem>>, vector<8x1xf32>
      %c0_11 = arith.constant 0 : index
      %c0_12 = arith.constant 0 : index
      %c0_13 = arith.constant 0 : index
      %14 = vector.load %arg4[%c0_11, %c0_12, %c0_13] : memref<1x8x1xf32, #tpu.memory_space<vmem>>, vector<1x8x1xf32>
      %15 = vector.shape_cast %14 : vector<1x8x1xf32> to vector<8x1xf32>
      %16 = vector.shape_cast %13 : vector<8x1xf32> to vector<1x8x1xf32>
      tpu.vector_store %arg4[%c0_11, %c0_12, %c0_13], %16 {strides = array<i32>} : memref<1x8x1xf32, #tpu.memory_space<vmem>>, vector<1x8x1xf32>,
    } else {
    }
    return
  }
  func.func @transform_0(%arg0: i32, %arg1: i32, %arg2: i32) -> (i32, i32, i32) {
    %c0_i32 = arith.constant 0 : i32
    return %arg0, %arg1, %arg2 : i32, i32, i32
  }
  func.func @transform_1(%arg0: i32, %arg1: i32, %arg2: i32) -> (i32, i32, i32) {
    %c0_i32 = arith.constant 0 : i32
    %c0_i32_0 = arith.constant 0 : i32
    return %arg0, %arg1, %c0_i32 : i32, i32, i32
  }
}

</mosaic_0001>

<bundles_post_ra>
// kernel: tpu_custom_call.1
= control target key start
LH: loop header
LB: loop body
LE: loop exit
PB: predicated region body
PF: predicated region fallthrough
CT: control target
= control target key end

     0   :  { %6 = vsyncpa [#allocation4], 0  ;;  %s521_s0 = inlined_call_operand.hbm [shape: f32[2,8,128], index: 0, kind: input, shape index: {}]   ;;  %s522_s1 = inlined_call_operand.vmem [shape: f32[2,8,1], index: 1, kind: output, shape index: {}]  }
   0x1   :  { %8 = vsyncpa [#allocation4 + $0x1], 0  ;;  %s433_s6 = smov 0   ;;  %s435_s7 = smov 0  }
   0x2   :  { %s437_s8 = smov 0   ;;  %s439_s9 = smov 0  }
   0x3   :  { %s441_s10 = smov 0   ;;  %s443_s11 = smov 0  }
   0x4 LB: > { %s273_s12 = sadd.s32 4294967295, %s420_s11   ;;  %s33_s13 = sadd.s32 1, %s416_s10  ;;  %s420_s11 = sphi %s443_s11, %s14_s11   ;;  %s416_s10 = sphi %s441_s10, %s529_s10   ;;  %s412_s9 = sphi %s439_s9, %s528_s9   ;;  %s408_s8 = sphi %s437_s8, %s527_s8   ;;  %s404_s7 = sphi %s435_s7, %s526_s7   ;;  %s400_s6 = sphi %s433_s6, %s525_s6  }
   0x5   : > { %p35_p0 = scmp.ge.s32.totalorder %s33_s13, 2  ;;  %s44_s14 = sadd.s32 1, %s408_s8 }
   0x6   : > { %p51_p1 = scmp.ne.s32.totalorder %s408_s8, %s404_s7  ;;  %p52_p2 = scmp.eq.s32.totalorder %s420_s11, 0 }
   0x7   : > { %s531_s13 = smov (%p35_p0, %s33_s13), 0  ;;  %p57_p4 = scmp.ne.s32.totalorder %s404_s7, %s400_s6 }
   0x8   : > { %p469_p3 = por %p52_p2, %p51_p1  ;;  %s37_s16 = ssub.s32 %s416_s10, %s531_s13 }
   0x9   : > { %p58_p5 = scmp.eq.s32.totalorder %s273_s12, 0  ;;  %p42_p6 = scmp.eq.s32.totalorder %s37_s16, 0 }
   0xa   : > { %p290_p8 = scmp.lt.s32.totalorder %s420_s11, 2  ;;  %s109_s19 = sand.u32 1, %s408_s8  }
   0xb   : > { %p476_p7 = por %p58_p5, %p57_p4  ;;  %s278_s20 = sshll.u32 %s416_s10, 3 }
   0xc   : > { %s482_s18 = scalar_select %p42_p6, %s408_s8, %s44_s14  }
   0xd   : > { %s277_s21 = sshll.u32 %s109_s19, 3  ;;  %s119_s24 = scalar_lea.hbm %s521_s0, %s278_s20 }
   0xe   : > { %s121_s25 = sshll.u32 %s119_s24, 4  ;;  %s113_s26 = scalar_lea.vmem [#allocation3], %s277_s21  ;;  %s122_s25 = int_to_ptr.hbm [resolvable:$true] %s121_s25 }
   0xf   : > { %s123_s27 = sshll.u32 %s113_s26, 4  ;;  %p287_p9 = pnand %p290_p8, %p469_p3  ;;  %s124_s27 = int_to_ptr.vmem [resolvable:$true] %s123_s27 }
  0x10   : > { %p279_p10 = scmp.ge.s32.totalorder %s420_s11, 1  ;;  %p128_p11 = scmp.lt.s32.totalorder %s420_s11, 3 }
  0x11   : > { %s110_s28 = scalar_lea.sflag [#allocation4], %s109_s19 }
  0x12   : > { %289 = dma.hbm_to_vmem [thread:$0]  (!%p287_p9), %s122_s25, 128, %s124_s27, %s110_s28  }
  0x13   : > { %p129_p12 = pnand %p279_p10, %p128_p11 }
  0x14   : > { %s134_s29 = sand.u32 (!%p129_p12), 1, %s404_s7  }
  0x15   : > { %132 = sbr.rel (%p129_p12) target bundleno = 155 (0x9b), region = 24  ;;  %s280_s30 = sshll.u32 (!%p129_p12), %s134_s29, 3 }
  0x16   : > { %s135_s2 = scalar_lea.sflag (!%p129_p12), [#allocation4], %s134_s29  ;;  %s138_s3 = scalar_lea.vmem (!%p129_p12), [#allocation3], %s280_s30 }
  0x1a   : > { %395 = dma.done.wait (%p476_p7), %s135_s2, 128  }
  0x1b   : > { %397 = vsyncadd (%p476_p7), %s135_s2, 4294967168  ;;  %vm171_vm0 = vcmask 7168   ;;  %v422_v0 = vmov -inf   ;;  %v173_v1 = vld [vmem:[%s138_s3] sm:$0xff]  ;;  %p160_p13 = scmp.lt.s32.totalorder %s412_s9, 1 }
  0x1c   : > { %172 = vst.msk [vmem:[#allocation2] sm:$0xff] %vm171_vm0, %v422_v0  ;;  %175 = vmax.xlane.f32.xlu0 %v173_v1 }
  0x1d   : > { %s533_s9 = smov (!%p160_p13, %s412_s9), 1 }
  0x1e   : > { %s281_s4 = sshll.u32 %s533_s9, 3 }
  0x1f   : > { %s166_s12 = scalar_lea.vmem %s522_s1, %s281_s4 }
  0x23   : > { %v174_v2 = vld [vmem:[#allocation2] sm:$0xff] }
  0x8f   : > { %v176_v3 = vpop.xlane.xlu0 %175 }
  0x90   : > { %v177_v4 = vmax.f32 %v174_v2, %v176_v3 }
  0x92   : > { %179 = vst.msk [vmem:[#allocation2] sm:$0xff] %vm171_vm0, %v177_v4 }
  0x99   : > { %v183_v5 = vld [vmem:[#allocation2] sm:$0xff] }
  0x9a   : > { %184 = vst.msk [vmem:[%s166_s12] sm:$0xff] %vm171_vm0, %v183_v5 }
  0x9b PF: > { %s14_s11 = sadd.s32 1, %s420_s11   ;;  %s525_s6 = smov %s404_s7 }
  0x9c   : > { %p11_p0 = scmp.ge.s32.totalorder %s14_s11, 4   ;;  %s526_s7 = smov %s408_s8 }
  0x9d   : > { %s527_s8 = smov %s482_s18  ;;  %s528_s9 = smov %s416_s10 }
  0x9e   : > { %s529_s10 = smov %s531_s13  ;;  %13 = sbr.rel (!%p11_p0) target bundleno = 4 (0x4), region = 72 }
  0xa3   :  { %210 = vsyncpa [#allocation4], 1 }
  0xa4   :  { %212 = vsyncpa [#allocation4 + $0x1], 1 }

</bundles_post_ra>
